<compile_context>
chip_gen: v6e
topology: v6e:2x2x1
jax: 0.10.0
libtpu: 0.0.40
codegen_flags: <defaults>
</compile_context>

<pallas_src>
import functools

import jax
import jax.numpy as jnp
from jax.experimental import pallas as pl
from jax.experimental.pallas import tpu as pltpu

LIN_DIM = 10
TILE_E = 65536             # default lane tile: multiple of 128, amortizes step overhead
PALLAS_MIN_EDGES = 16384   # below this, launch + per-step overhead >= total DMA time
_SUBLANE_PAD_ROWS = 16     # a (10, *) block pads to 16 sublanes in VMEM (f32 and bf16)


def _edge_mm_kernel(lin_ref, a_ref, e_ref):
    # e[0, :] = sum_k lin[k] * a[k, :]
    # lin_ref: (LIN_DIM,) f32 in SMEM      -- scalar weights, resident
    # a_ref:   (LIN_DIM, tile_e) in VMEM   -- streamed edge features, native dtype
    # e_ref:   (1, tile_e) f32 in VMEM     -- lane-dense output block
    #
    # Unrolled per-row scalar*vector multiply-accumulate: pure VALU work on the
    # streamed block (no (10, tile_e) broadcast temporary, no padded sublane
    # reduce), upcast to f32 in-register so sub-f32 inputs move HBM->VMEM at
    # their native width while accumulation stays f32.
    acc = lin_ref[0] * a_ref[pl.ds(0, 1), :].astype(jnp.float32)
    for k in range(1, LIN_DIM):
        acc = acc + lin_ref[k] * a_ref[pl.ds(k, 1), :].astype(jnp.float32)
    e_ref[...] = acc


def _round_up(x: int, m: int) -> int:
    return ((x + m - 1) // m) * m


def _pick_tile(num_edges: int, tile_e: int) -> int:
    """Pick the lane tile; keep the grid >= 2 steps so both v7x TCs get work."""
    if num_edges >= 2 * tile_e:
        return tile_e
    return min(tile_e, max(128, _round_up(pl.cdiv(num_edges, 2), 128)))


def _vmem_limit_bytes(tile_e: int, in_itemsize: int) -> int:
    # Budget from the PADDED blocks (10 rows -> 16 sublanes), double-buffered
    # input + double-buffered output, plus headroom for the tiny SMEM weight
    # block and compiler scratch.
    in_block = _SUBLANE_PAD_ROWS * tile_e * in_itemsize
    out_block = 8 * tile_e * 4
    return 2 * in_block + 2 * out_block + (2 << 20)


@functools.partial(jax.jit, static_argnames=("tile_e",))
def _edge_mm_pallas_impl(lin_vec, src_a, *, tile_e):
    num_edges = src_a.shape[1]
    in_itemsize = jnp.dtype(src_a.dtype).itemsize
    grid = (pl.cdiv(num_edges, tile_e),)  # ragged final block handled by Pallas
    return pl.pallas_call(
        _edge_mm_kernel,
        out_shape=jax.ShapeDtypeStruct((1, num_edges), jnp.float32),
        grid=grid,
        in_specs=[
            # 10 scalar weights -> SMEM, read as scalars in the unrolled MAC.
            pl.BlockSpec(memory_space=pltpu.MemorySpace.SMEM),
            # Stream tile_e edge columns per grid step at the input's native
            # width (upcast happens in-kernel); auto double-buffered.
            pl.BlockSpec((LIN_DIM, tile_e), lambda i: (0, i)),
        ],
        out_specs=pl.BlockSpec((1, tile_e), lambda i: (0, i)),
        compiler_params=pltpu.CompilerParams(
            # Edge blocks are fully independent -> shard across TCs on v7x.
            dimension_semantics=("parallel",),
            vmem_limit_bytes=_vmem_limit_bytes(tile_e, in_itemsize),
        ),
        cost_estimate=pl.CostEstimate(
            flops=2 * LIN_DIM * num_edges,
            transcendentals=0,
            bytes_accessed=num_edges * (LIN_DIM * in_itemsize + 4) + LIN_DIM * 4,
        ),
    )(lin_vec, src_a)


def edge_mm_pallas(linear: jax.Array, src_a: jax.Array,
                   *, tile_e: int = TILE_E) -> jax.Array:
    """torch.mm(self.linear, edges.src['a']) with `linear` viewed as (1, 10)."""
    assert linear.shape == (LIN_DIM,)
    assert src_a.shape[0] == LIN_DIM
    num_edges = src_a.shape[1]

    lin_f32 = linear.astype(jnp.float32)

    if num_edges < PALLAS_MIN_EDGES:
        # Tiny problems: the whole job is well under a MiB of traffic; plain
        # XLA beats kernel-launch + per-grid-step overhead.
        return lin_f32.reshape(1, LIN_DIM) @ src_a.astype(jnp.float32)

    # NOTE: src_a is NOT cast here -- the kernel upcasts in-register, so the
    # HBM stream stays at the input's native width (bf16 reads stay 2 B/elem).
    eff_tile = _pick_tile(num_edges, tile_e)
    return _edge_mm_pallas_impl(lin_f32, src_a, tile_e=eff_tile)


class T:
    """JAX/Pallas port of the PyTorch module T."""

    def __init__(self, key: jax.Array):
        # torch.FloatTensor(10) is an uninitialized (10,) f32 parameter;
        # initialize deterministically instead.
        self.linear = jax.random.normal(key, (LIN_DIM,), dtype=jnp.float32)

    def edge_func(self, src_a: jax.Array):
        # torch.mm(self.linear, edges.src['a'])
        return {"e": edge_mm_pallas(self.linear, src_a)}

    def reduce_func(self):
        return {"": 0}

    def forward(self, g):
        # Exact semantics of the PyTorch module: forward ignores g, returns 0.
        # TODO(synk): DGL graph message passing itself has no Pallas equivalent
        # here; only edge_func's matmul is a real kernel.
        return 0


if __name__ == "__main__":
    key = jax.random.PRNGKey(0)
    k_param, k_small, k_med, k_def = jax.random.split(key, 4)

    model = T(k_param)
    lin_row = model.linear.reshape(1, LIN_DIM)

    # 1) Tiny E: takes the XLA fallback path (Pallas would be pure overhead).
    src_small = jax.random.normal(k_small, (LIN_DIM, 16), dtype=jnp.float32)
    e_small = model.edge_func(src_small)["e"]

    # 2) Multi-step Pallas grid with a ragged final block (explicit small tile
    #    keeps the demo footprint small while exercising the pipeline: 4 steps).
    n_med = 3 * 8192 + 384
    src_med = jax.random.normal(k_med, (LIN_DIM, n_med), dtype=jnp.float32)
    e_med = edge_mm_pallas(model.linear, src_med, tile_e=8192)

    # 3) Default-tile path: E < 2*TILE_E so the tile auto-shrinks to give the
    #    grid exactly 2 steps (both v7x TCs busy).  bf16 input exercises the
    #    in-kernel upcast (HBM reads at native width, f32 accumulation).
    n_def = PALLAS_MIN_EDGES + 5000
    src_def = jax.random.normal(k_def, (LIN_DIM, n_def),
                                dtype=jnp.float32).astype(jnp.bfloat16)
    e_def = model.edge_func(src_def)["e"]

    jax.block_until_ready((e_small, e_med, e_def))

    assert e_small.shape == (1, 16)
    assert e_med.shape == (1, n_med)
    assert e_def.shape == (1, n_def)
    assert jnp.allclose(e_small, lin_row @ src_small, atol=1e-5, rtol=1e-5)
    assert jnp.allclose(e_med, lin_row @ src_med, atol=1e-4, rtol=1e-4)
    ref_def = lin_row @ src_def.astype(jnp.float32)
    assert jnp.allclose(e_def, ref_def, atol=1e-3, rtol=1e-3)

    # Forward pass exactly reproduces the PyTorch module: returns 0.
    assert model.forward(g=None) == 0

    print("KERNEL_OK")
</pallas_src>

<mosaic_0001>
module attributes {stable_mosaic.version = 11 : i64} {
  func.func @_edge_mm_kernel(%arg0: i32, %arg1: memref<10xf32, #tpu.memory_space<smem>>, %arg2: memref<10x8192xf32, #tpu.memory_space<vmem>>, %arg3: memref<1x8192xf32, #tpu.memory_space<vmem>>) attributes {dimension_semantics = [#tpu.dimension_semantics<parallel>], iteration_bounds = array<i64: 4>, scalar_prefetch = 0 : i64, scratch_operands = 0 : i64, tpu.core_type = #tpu.core_type<tc>, window_params = [{transform_indices = @transform_0, window_bounds = array<i64: 10>}, {transform_indices = @transform_1, window_bounds = array<i64: 10, 8192>}, {transform_indices = @transform_2, window_bounds = array<i64: 1, 8192>}]} {
    %c0 = arith.constant 0 : index
    %0 = memref.load %arg1[%c0] : memref<10xf32, #tpu.memory_space<smem>>
    %c0_0 = arith.constant 0 : index
    %c0_1 = arith.constant 0 : index
    %1 = vector.load %arg2[%c0_0, %c0_1] : memref<10x8192xf32, #tpu.memory_space<vmem>>, vector<1x8192xf32>
    %2 = vector.broadcast %0 : f32 to vector<1x8192xf32>
    %3 = arith.mulf %2, %1 : vector<1x8192xf32>
    %c1 = arith.constant 1 : index
    %4 = memref.load %arg1[%c1] : memref<10xf32, #tpu.memory_space<smem>>
    %c1_2 = arith.constant 1 : index
    %c0_3 = arith.constant 0 : index
    %5 = vector.load %arg2[%c1_2, %c0_3] : memref<10x8192xf32, #tpu.memory_space<vmem>>, vector<1x8192xf32>
    %6 = vector.broadcast %4 : f32 to vector<1x8192xf32>
    %7 = arith.mulf %6, %5 : vector<1x8192xf32>
    %8 = arith.addf %3, %7 : vector<1x8192xf32>
    %c2 = arith.constant 2 : index
    %9 = memref.load %arg1[%c2] : memref<10xf32, #tpu.memory_space<smem>>
    %c2_4 = arith.constant 2 : index
    %c0_5 = arith.constant 0 : index
    %10 = vector.load %arg2[%c2_4, %c0_5] : memref<10x8192xf32, #tpu.memory_space<vmem>>, vector<1x8192xf32>
    %11 = vector.broadcast %9 : f32 to vector<1x8192xf32>
    %12 = arith.mulf %11, %10 : vector<1x8192xf32>
    %13 = arith.addf %8, %12 : vector<1x8192xf32>
    %c3 = arith.constant 3 : index
    %14 = memref.load %arg1[%c3] : memref<10xf32, #tpu.memory_space<smem>>
    %c3_6 = arith.constant 3 : index
    %c0_7 = arith.constant 0 : index
    %15 = vector.load %arg2[%c3_6, %c0_7] : memref<10x8192xf32, #tpu.memory_space<vmem>>, vector<1x8192xf32>
    %16 = vector.broadcast %14 : f32 to vector<1x8192xf32>
    %17 = arith.mulf %16, %15 : vector<1x8192xf32>
    %18 = arith.addf %13, %17 : vector<1x8192xf32>
    %c4 = arith.constant 4 : index
    %19 = memref.load %arg1[%c4] : memref<10xf32, #tpu.memory_space<smem>>
    %c4_8 = arith.constant 4 : index
    %c0_9 = arith.constant 0 : index
    %20 = vector.load %arg2[%c4_8, %c0_9] : memref<10x8192xf32, #tpu.memory_space<vmem>>, vector<1x8192xf32>
    %21 = vector.broadcast %19 : f32 to vector<1x8192xf32>
    %22 = arith.mulf %21, %20 : vector<1x8192xf32>
    %23 = arith.addf %18, %22 : vector<1x8192xf32>
    %c5 = arith.constant 5 : index
    %24 = memref.load %arg1[%c5] : memref<10xf32, #tpu.memory_space<smem>>
    %c5_10 = arith.constant 5 : index
    %c0_11 = arith.constant 0 : index
    %25 = vector.load %arg2[%c5_10, %c0_11] : memref<10x8192xf32, #tpu.memory_space<vmem>>, vector<1x8192xf32>
    %26 = vector.broadcast %24 : f32 to vector<1x8192xf32>
    %27 = arith.mulf %26, %25 : vector<1x8192xf32>
    %28 = arith.addf %23, %27 : vector<1x8192xf32>
    %c6 = arith.constant 6 : index
    %29 = memref.load %arg1[%c6] : memref<10xf32, #tpu.memory_space<smem>>
    %c6_12 = arith.constant 6 : index
    %c0_13 = arith.constant 0 : index
    %30 = vector.load %arg2[%c6_12, %c0_13] : memref<10x8192xf32, #tpu.memory_space<vmem>>, vector<1x8192xf32>
    %31 = vector.broadcast %29 : f32 to vector<1x8192xf32>
    %32 = arith.mulf %31, %30 : vector<1x8192xf32>
    %33 = arith.addf %28, %32 : vector<1x8192xf32>
    %c7 = arith.constant 7 : index
    %34 = memref.load %arg1[%c7] : memref<10xf32, #tpu.memory_space<smem>>
    %c7_14 = arith.constant 7 : index
    %c0_15 = arith.constant 0 : index
    %35 = vector.load %arg2[%c7_14, %c0_15] : memref<10x8192xf32, #tpu.memory_space<vmem>>, vector<1x8192xf32>
    %36 = vector.broadcast %34 : f32 to vector<1x8192xf32>
    %37 = arith.mulf %36, %35 : vector<1x8192xf32>
    %38 = arith.addf %33, %37 : vector<1x8192xf32>
    %c8 = arith.constant 8 : index
    %39 = memref.load %arg1[%c8] : memref<10xf32, #tpu.memory_space<smem>>
    %c8_16 = arith.constant 8 : index
    %c0_17 = arith.constant 0 : index
    %40 = vector.load %arg2[%c8_16, %c0_17] : memref<10x8192xf32, #tpu.memory_space<vmem>>, vector<1x8192xf32>
    %41 = vector.broadcast %39 : f32 to vector<1x8192xf32>
    %42 = arith.mulf %41, %40 : vector<1x8192xf32>
    %43 = arith.addf %38, %42 : vector<1x8192xf32>
    %c9 = arith.constant 9 : index
    %44 = memref.load %arg1[%c9] : memref<10xf32, #tpu.memory_space<smem>>
    %c9_18 = arith.constant 9 : index
    %c0_19 = arith.constant 0 : index
    %45 = vector.load %arg2[%c9_18, %c0_19] : memref<10x8192xf32, #tpu.memory_space<vmem>>, vector<1x8192xf32>
    %46 = vector.broadcast %44 : f32 to vector<1x8192xf32>
    %47 = arith.mulf %46, %45 : vector<1x8192xf32>
    %48 = arith.addf %43, %47 : vector<1x8192xf32>
    %c0_20 = arith.constant 0 : index
    %c0_21 = arith.constant 0 : index
    %49 = vector.load %arg3[%c0_20, %c0_21] : memref<1x8192xf32, #tpu.memory_space<vmem>>, vector<1x8192xf32>
    tpu.vector_store %arg3[%c0_20, %c0_21], %48 {strides = array<i32>} : memref<1x8192xf32, #tpu.memory_space<vmem>>, vector<1x8192xf32>,
    return
  }
  func.func @transform_0(%arg0: i32) -> i32 {
    %c0_i32 = arith.constant 0 : i32
    %c0_i32_0 = arith.constant 0 : i32
    return %c0_i32 : i32
  }
  func.func @transform_1(%arg0: i32) -> (i32, i32) {
    %c0_i32 = arith.constant 0 : i32
    %c0_i32_0 = arith.constant 0 : i32
    return %c0_i32, %arg0 : i32, i32
  }
  func.func @transform_2(%arg0: i32) -> (i32, i32) {
    %c0_i32 = arith.constant 0 : i32
    %c0_i32_0 = arith.constant 0 : i32
    return %c0_i32, %arg0 : i32, i32
  }
}

</mosaic_0001>

<bundles_post_ra>
// kernel: _edge_mm_pallas_impl.1
= control target key start
LH: loop header
LB: loop body
LE: loop exit
PB: predicated region body
PF: predicated region fallthrough
CT: control target
= control target key end

     0   :  { %7 = vsyncpa [#allocation5], 0  ;;  %s1625_s0 = inlined_call_operand.hbm [shape: f32[10], index: 0, kind: input, shape index: {}]   ;;  %s1626_s1 = inlined_call_operand.hbm [shape: f32[10,24960], index: 1, kind: input, shape index: {}]   ;;  %s1627_s2 = inlined_call_operand.hbm [shape: f32[1,24960], index: 2, kind: output, shape index: {}]  }
   0x1   :  { %8 = vsyncpa [#allocation3], 0 }
   0x2   :  { %10 = vsyncpa [#allocation3 + $0x1], 0 }
   0x3   :  { %11 = vsyncpa [#allocation4], 0 }
   0x4   :  { %13 = vsyncpa [#allocation4 + $0x1], 0  ;;  %s1165_s9 = smov 0   ;;  %s1167_s10 = smov 0  }
   0x5   :  { %s1169_s11 = smov 0   ;;  %s1171_s12 = smov 0  }
   0x6 LB: > { %s1186_s13 = sadd.s32 4294967295, %s1143_s12   ;;  %s792_s14 = sadd.s32 4294967294, %s1143_s12   ;;  %s1143_s12 = sphi %s1171_s12, %s1641_s12   ;;  %s1139_s11 = sphi %s1169_s11, %s1640_s11   ;;  %s1135_s10 = sphi %s1167_s10, %s1639_s10   ;;  %s1131_s9 = sphi %s1165_s9, %s1638_s9  }
   0x7   : > { %s1190_s15 = sadd.s32 1, %s1143_s12   ;;  %s47_s16 = sadd.s32 1, %s1139_s11 }
   0x8   : > { %s44_s17 = ssub.s32 %s1143_s12, %s1190_s15  ;;  %p54_p0 = scmp.ne.s32.totalorder %s1139_s11, %s1135_s10 }
   0x9   : > { %p45_p1 = scmp.eq.s32.totalorder %s44_s17, 0  ;;  %p55_p2 = scmp.eq.s32.totalorder %s1143_s12, 0 }
   0xa   : > { %p60_p3 = scmp.ne.s32.totalorder %s1135_s10, %s1131_s9  ;;  %p1628_p4 = scmp.eq.s32.totalorder %s1186_s13, 0 }
   0xb   : > { %s1202_s18 = scalar_select %p45_p1, %s1139_s11, %s47_s16  }
   0xc   : > { %p1204_p5 = por %p55_p2, %p54_p0  ;;  %p1210_p6 = por %p1628_p4, %p60_p3 }
   0xd   : > { %p84_p7 = scmp.eq.s32.totalorder %s1186_s13, 3  ;;  %p90_p8 = scmp.eq.s32.totalorder %s792_s14, 3 }
   0xe   : > { %p793_p9 = scmp.ge.s32.totalorder %s1143_s12, 1  ;;  %p97_p10 = scmp.lt.s32.totalorder %s1143_s12, 5 }
   0xf   : > { %p1217_p11 = por %p84_p7, %p54_p0  ;;  %p1221_p12 = por %p90_p8, %p60_p3 }
  0x10   : > { %p1225_p13 = pnand %p793_p9, %p97_p10  ;;  %s1145_s24 = smov [#allocation2]  }
  0x11   : > { %s1631_s21 = scalar_select %p1217_p11, 1, 0 }
  0x12   : > { %s1632_s22 = scalar_select %p1221_p12, 1, 0 }
  0x13   : > { %p992_p1 = pneg %p1225_p13  ;;  %p795_p0 = scmp.ge.s32.totalorder %s1143_s12, 4 }
  0x15   : > { %p993_p2 = pnand %p992_p1, %p1628_p4  ;;  %115 = sbr.rel (%p795_p0) target bundleno = 58 (0x3a), region = 20 }
  0x17   : > { %995 = dma.hbm_to_smem (!%p993_p2), %s1625_s0, 16, %s1145_s24, [#allocation5]  }
  0x1a   : > { %118 = sbr.rel (!%p1204_p5) target bundleno = 58 (0x3a), region = 24  ;;  %s119_s27 = sand.u32 (%p1204_p5), 1, %s1139_s11  }
  0x1b   : > { %s797_s28 = sshll.u32 (%p1204_p5), %s1143_s12, 6  ;;  %s796_s29 = sshll.u32 (%p1204_p5), %s119_s27, 10 }
  0x1c   : > { %s125_s30 = ssub.s32 (%p1204_p5), 195, %s797_s28  ;;  %s1247_s5 = scalar_lea.sflag (%p1204_p5), [#allocation3], %s119_s27 }
  0x1d   : > { %p126_p3 = scmp.lt.s32.totalorder (%p1204_p5), %s125_s30, 64  ;;  %s123_s6 = scalar_lea.vmem (%p1204_p5), [#allocation6], %s796_s29 }
  0x1f   : > { %s1643_s30 = smov (!%p126_p3, %s125_s30), 64 }
  0x20   : > { %s1244_s3 = sshll.u32 %s1643_s30, 8 }
  0x21   : > { %s130_s4 = ssub.s32 16384, %s1244_s3 }
  0x22   : > { %131 = vsyncadd %s1247_s5, %s130_s4  ;;  %p799_p5 = scmp.ne.s32.totalorder %s1244_s3, 0  ;;  %s982_s7 = sshll.u32 %s1143_s12, 13 }
  0x23   : > { %s1255_s16 = scalar_lea.hbm %s1626_s1, %s982_s7  ;;  %s801_s17 = sshll.u32 %s1643_s30, 3 }
  0x24   : > { %s137_s19 = sshll.u32 %s123_s6, 4  ;;  %s1049_s24 = scalar_lea.hbm %s1255_s16, %s1244_s3  ;;  %s1258_s19 = int_to_ptr.vmem [resolvable:$true] %s137_s19 }
  0x25   : > { %p1050_p7 = scmp.ne.s32.totalorder %s1255_s16, %s1049_s24  ;;  %s1053_s27 = scalar_lea.hbm %s1626_s1, 49920 }
  0x26   : > { %p1054_p10 = scmp.lt.s32.totalorder %s1255_s16, %s1626_s1  ;;  %p1055_p1 = scmp.lt.s32.totalorder %s1053_s27, %s1049_s24 }
  0x27   : > { %p1051_p8 = pnand %p1050_p7, %p799_p5 }
  0x28   : > { %p1056_p2 = por %p1055_p1, %p1054_p10 }
  0x29   : > { %p1052_p9 = pneg %p1051_p8 }
  0x2b   : > { %p1057_p0 = pnand %p1056_p2, %p1052_p9 }
  0x2d   : > { %1060 = shalt.err (!%p1057_p0)
}
  0x2e   : > { %s1061_s4 = scalar_lea.vmem %s1258_s19, %s1244_s3  ;;  %s1146_s6 = smov [#allocation6]  }
  0x2f   : > { %p1062_p3 = scmp.ne.s32.totalorder %s1258_s19, %s1061_s4  ;;  %s1065_s7 = sshll.u32 %s1146_s6, 4  ;;  %s1066_s7 = int_to_ptr.vmem [resolvable:$false] %s1065_s7 }
  0x30   : > { %s1067_s8 = scalar_lea.vmem %s1066_s7, 32768  ;;  %p1068_p4 = scmp.lt.s32.totalorder %s1258_s19, %s1066_s7 }
  0x31   : > { %p1063_p7 = pnand %p1062_p3, %p799_p5  ;;  %p1069_p12 = scmp.lt.s32.totalorder %s1067_s8, %s1061_s4 }
  0x33   : > { %p1064_p8 = pneg %p1063_p7  ;;  %p1070_p11 = por %p1069_p12, %p1068_p4 }
  0x35   : > { %p1071_p10 = pnand %p1070_p11, %p1064_p8 }
  0x37   : > { %1074 = shalt.err (!%p1071_p10)
}
  0x38   : > { %s1147_s14 = smov 24960   ;;  %s1148_s24 = smov 8192  }
  0x39   : > { %143 = dma.hbm_to_vmem [thread:$0]  (%p799_p5), %s1255_s16, %s1244_s3, %s1258_s19, %s1247_s5, %s1147_s14, %s1148_s24, %s801_s17  }
  0x3a PF: > { %149 = sbr.rel (%p1225_p13) target bundleno = 198 (0xc6), region = 28  ;;  %p1634_p4 = scmp.eq.s32.totalorder (!%p1225_p13), %s1186_s13, 0 }
  0x3f   : > { %1118 = dma.done.wait (%p1634_p4), [#allocation5], 16   ;;  %p1635_p11 = pmov %p1634_p4 }
  0x40   : > { %s1293_s25 = sand.u32 1, %s1135_s10  }
  0x41   : > { %1120 = vsyncadd (%p1635_p11), [#allocation5], 4294967280  ;;  %s806_s26 = sshll.u32 %s1293_s25, 10  ;;  %s156_s30 = scalar_lea.sflag [#allocation3], %s1293_s25 }
  0x42   : > { %s1297_s3 = scalar_lea.vmem [#allocation6], %s806_s26 }
  0x43   : > { %1122 = dma.done.wait (%p1210_p6), %s156_s30, 16384  }
  0x44   : > { %1124 = vsyncadd (%p1210_p6), %s156_s30, 4294950912 }
  0x45   : > { %164 = sfence }
  0x46   : > { %s191_s23 = sld [smem:[#allocation2]]  ;;  %v192_v0 = vld [vmem:[%s1297_s3] ss:$8 sm:$0xf]  ;;  %s807_s28 = sshll.u32 %s1293_s25, 6 }
  0x47   : > { %v193_v1 = vld [vmem:[%s1297_s3] ss:$8 sm:$0xf0]  ;;  %s822_s5 = sld [smem:[#allocation2 + $0x1]]  ;;  %s1389_s7 = scalar_lea.vmem [#allocation7], %s807_s28 }
  0x48   : > { %v823_v2 = vld [vmem:[%s1297_s3 + $0x1] ss:$8 sm:$0xf]  ;;  %v194_v4 = vor.u32 %v193_v1, %v192_v0  ;;  %s839_s20 = sld [smem:[#allocation2 + $0x2]]  ;;  %s691_s8 = scalar_lea.sflag [#allocation4], %s1293_s25 }
  0x49   : > { %v824_v3 = vld [vmem:[%s1297_s3 + $0x1] ss:$8 sm:$0xf0]  ;;  %v840_v5 = vld [vmem:[%s1297_s3 + $0x2] ss:$8 sm:$0xf] }
  0x4a   : > { %v236_v6 = vor.u32 %v824_v3, %v823_v2  ;;  %v841_v7 = vld [vmem:[%s1297_s3 + $0x2] ss:$8 sm:$0xf0]  ;;  %s856_s16 = sld [smem:[#allocation2 + $0x3]]  ;;  %p1636_p6 = scmp.ne.s32.totalorder %s1631_s21, 0 }
  0x4b   : > { %v857_v8 = vld [vmem:[%s1297_s3 + $0x3] ss:$8 sm:$0xf]  ;;  %v286_v11 = vor.u32 %v841_v7, %v840_v5  ;;  %s873_s17 = sld [smem:[#allocation2 + $0x4]]  ;;  %s976_s14 = sshll.u32 (%p1636_p6), %s1186_s13, 6 }
  0x4c   : > { %v858_v9 = vld [vmem:[%s1297_s3 + $0x3] ss:$8 sm:$0xf0]  ;;  %v1311_v10 = vstv %s191_s23  ;;  %v874_v12 = vld [vmem:[%s1297_s3 + $0x4] ss:$8 sm:$0xf] }
  0x4d   : > { %v224_v13 = vmul.f32 %v1311_v10, %v194_v4  ;;  %v1315_v14 = vstv %s822_s5  ;;  %v336_v15 = vor.u32 %v858_v9, %v857_v8  ;;  %v875_v16 = vld [vmem:[%s1297_s3 + $0x4] ss:$8 sm:$0xf0]  ;;  %s890_s19 = sld [smem:[#allocation2 + $0x5]]  ;;  %s699_s24 = ssub.s32 (%p1636_p6), 195, %s976_s14 }
  0x4e   : > { %v266_v17 = vmul.f32 %v1315_v14, %v236_v6  ;;  %v891_v18 = vld [vmem:[%s1297_s3 + $0x5] ss:$8 sm:$0xf]  ;;  %v1321_v20 = vstv %s839_s20  ;;  %v386_v21 = vor.u32 %v875_v16, %v874_v12  ;;  %s907_s27 = sld [smem:[#allocation2 + $0x6]]  ;;  %p700_p12 = scmp.lt.s32.totalorder (%p1636_p6), %s699_s24, 64 }
  0x4f   : > { %v892_v19 = vld [vmem:[%s1297_s3 + $0x5] ss:$8 sm:$0xf0]  ;;  %v908_v22 = vld [vmem:[%s1297_s3 + $0x6] ss:$8 sm:$0xf]  ;;  %v316_v24 = vmul.f32 %v1321_v20, %v286_v11 }
  0x50   : > { %v274_v23 = vadd.f32 %v266_v17, %v224_v13  ;;  %v1326_v25 = vstv %s856_s16  ;;  %v436_v26 = vor.u32 %v892_v19, %v891_v18  ;;  %v909_v27 = vld [vmem:[%s1297_s3 + $0x6] ss:$8 sm:$0xf0]  ;;  %s924_s29 = sld [smem:[#allocation2 + $0x7]] }
  0x51   : > { %v366_v28 = vmul.f32 %v1326_v25, %v336_v15  ;;  %v925_v29 = vld [vmem:[%s1297_s3 + $0x7] ss:$8 sm:$0xf]  ;;  %v1332_v32 = vstv %s873_s17  ;;  %v486_v33 = vor.u32 %v909_v27, %v908_v22  ;;  %s941_s4 = sld [smem:[#allocation2 + $0x8]] }
  0x52   : > { %v926_v30 = vld [vmem:[%s1297_s3 + $0x7] ss:$8 sm:$0xf0]  ;;  %v324_v31 = vadd.f32 %v316_v24, %v274_v23  ;;  %v942_v34 = vld [vmem:[%s1297_s3 + $0x200] ss:$8 sm:$0xf]  ;;  %v416_v35 = vmul.f32 %v1332_v32, %v386_v21 }
  0x53   : > { %v1336_v36 = vstv %s890_s19  ;;  %v536_v37 = vor.u32 %v926_v30, %v925_v29  ;;  %v943_v38 = vld [vmem:[%s1297_s3 + $0x200] ss:$8 sm:$0xf0]  ;;  %s958_s6 = sld [smem:[#allocation2 + $0x9]] }
  0x54   : > { %v374_v39 = vadd.f32 %v366_v28, %v324_v31  ;;  %v466_v40 = vmul.f32 %v1336_v36, %v436_v26  ;;  %v959_v41 = vld [vmem:[%s1297_s3 + $0x201] ss:$8 sm:$0xf]  ;;  %v1342_v43 = vstv %s907_s27  ;;  %v586_v44 = vor.u32 %v943_v38, %v942_v34  ;;  %v808_v45 = vld [vmem:[%s1297_s3 + $0x40] ss:$8 sm:$0xf] }
  0x55   : > { %v960_v42 = vld [vmem:[%s1297_s3 + $0x201] ss:$8 sm:$0xf0]  ;;  %v809_v46 = vld [vmem:[%s1297_s3 + $0x40] ss:$8 sm:$0xf0]  ;;  %v516_v48 = vmul.f32 %v1342_v43, %v486_v33 }
  0x56   : > { %v424_v47 = vadd.f32 %v416_v35, %v374_v39  ;;  %v1347_v49 = vstv %s924_s29  ;;  %v198_v50 = vor.u32 %v809_v46, %v808_v45  ;;  %v825_v51 = vld [vmem:[%s1297_s3 + $0x41] ss:$8 sm:$0xf]  ;;  %v636_v54 = vor.u32 %v960_v42, %v959_v41  ;;  %v842_v56 = vld [vmem:[%s1297_s3 + $0x42] ss:$8 sm:$0xf] }
  0x57   : > { %v826_v52 = vld [vmem:[%s1297_s3 + $0x41] ss:$8 sm:$0xf0]  ;;  %v566_v53 = vmul.f32 %v1347_v49, %v536_v37  ;;  %v843_v57 = vld [vmem:[%s1297_s3 + $0x42] ss:$8 sm:$0xf0]  ;;  %v1354_v59 = vstv %s941_s4 }
  0x58   : > { %v240_v55 = vor.u32 %v826_v52, %v825_v51  ;;  %v474_v58 = vadd.f32 %v466_v40, %v424_v47  ;;  %v225_v60 = vmul.f32 %v1311_v10, %v198_v50  ;;  %v290_v61 = vor.u32 %v843_v57, %v842_v56  ;;  %v859_v62 = vld [vmem:[%s1297_s3 + $0x43] ss:$8 sm:$0xf]  ;;  %v876_v3 = vld [vmem:[%s1297_s3 + $0x44] ss:$8 sm:$0xf] }
  0x59   : > { %v860_v63 = vld [vmem:[%s1297_s3 + $0x43] ss:$8 sm:$0xf0]  ;;  %v1359_v0 = vstv %s958_s6  ;;  %v877_v4 = vld [vmem:[%s1297_s3 + $0x44] ss:$8 sm:$0xf0]  ;;  %v616_v6 = vmul.f32 %v1354_v59, %v586_v44 }
  0x5a   : > { %v267_v1 = vmul.f32 %v1315_v14, %v240_v55  ;;  %v340_v2 = vor.u32 %v860_v63, %v859_v62  ;;  %v524_v5 = vadd.f32 %v516_v48, %v474_v58  ;;  %v317_v7 = vmul.f32 %v1321_v20, %v290_v61  ;;  %v893_v9 = vld [vmem:[%s1297_s3 + $0x45] ss:$8 sm:$0xf]  ;;  %v910_v16 = vld [vmem:[%s1297_s3 + $0x46] ss:$8 sm:$0xf] }
  0x5b   : > { %v390_v8 = vor.u32 %v877_v4, %v876_v3  ;;  %v894_v11 = vld [vmem:[%s1297_s3 + $0x45] ss:$8 sm:$0xf0]  ;;  %v911_v17 = vld [vmem:[%s1297_s3 + $0x46] ss:$8 sm:$0xf0]  ;;  %v666_v19 = vmul.f32 %v1359_v0, %v636_v54 }
  0x5c   : > { %v275_v12 = vadd.f32 %v267_v1, %v225_v60  ;;  %v367_v13 = vmul.f32 %v1326_v25, %v340_v2  ;;  %v440_v15 = vor.u32 %v894_v11, %v893_v9  ;;  %v574_v18 = vadd.f32 %v566_v53, %v524_v5  ;;  %v927_v21 = vld [vmem:[%s1297_s3 + $0x47] ss:$8 sm:$0xf]  ;;  %v944_v27 = vld [vmem:[%s1297_s3 + $0x240] ss:$8 sm:$0xf] }
  0x5d   : > { %v928_v22 = vld [vmem:[%s1297_s3 + $0x47] ss:$8 sm:$0xf0]  ;;  %v417_v24 = vmul.f32 %v1332_v32, %v390_v8  ;;  %v490_v26 = vor.u32 %v911_v17, %v910_v16  ;;  %v945_v28 = vld [vmem:[%s1297_s3 + $0x240] ss:$8 sm:$0xf0] }
  0x5e   : > { %v325_v23 = vadd.f32 %v317_v7, %v275_v12  ;;  %v624_v29 = vadd.f32 %v616_v6, %v574_v18  ;;  %v961_v30 = vld [vmem:[%s1297_s3 + $0x241] ss:$8 sm:$0xf]  ;;  %v467_v34 = vmul.f32 %v1336_v36, %v440_v15  ;;  %v540_v35 = vor.u32 %v928_v22, %v927_v21  ;;  %v810_v37 = vld [vmem:[%s1297_s3 + $0x80] ss:$8 sm:$0xf] }
  0x5f   : > { %v962_v31 = vld [vmem:[%s1297_s3 + $0x241] ss:$8 sm:$0xf0]  ;;  %v811_v38 = vld [vmem:[%s1297_s3 + $0x80] ss:$8 sm:$0xf0]  ;;  %v590_v40 = vor.u32 %v945_v28, %v944_v27  ;;  %v517_v46 = vmul.f32 %v1342_v43, %v490_v26 }
  0x60   : > { %v375_v33 = vadd.f32 %v367_v13, %v325_v23  ;;  %v674_v39 = vadd.f32 %v666_v19, %v624_v29  ;;  %v202_v41 = vor.u32 %v811_v38, %v810_v37  ;;  %v827_v42 = vld [vmem:[%s1297_s3 + $0x81] ss:$8 sm:$0xf]  ;;  %v844_v48 = vld [vmem:[%s1297_s3 + $0x82] ss:$8 sm:$0xf]  ;;  %v640_v51 = vor.u32 %v962_v31, %v961_v30 }
  0x61   : > { %v828_v44 = vld [vmem:[%s1297_s3 + $0x81] ss:$8 sm:$0xf0]  ;;  %v845_v50 = vld [vmem:[%s1297_s3 + $0x82] ss:$8 sm:$0xf0]  ;;  %v567_v57 = vmul.f32 %v1347_v49, %v540_v35  ;;  %v617_v63 = vmul.f32 %v1354_v59, %v590_v40 }
  0x62   : > { %v425_v45 = vadd.f32 %v417_v24, %v375_v33  ;;  %v244_v47 = vor.u32 %v828_v44, %v827_v42  ;;  %682 = vst [vmem:[%s1389_s7] sm:$0xff] %v674_v39  ;;  %v226_v52 = vmul.f32 %v1311_v10, %v202_v41  ;;  %v294_v53 = vor.u32 %v845_v50, %v844_v48  ;;  %v861_v54 = vld [vmem:[%s1297_s3 + $0x83] ss:$8 sm:$0xf]  ;;  %v878_v61 = vld [vmem:[%s1297_s3 + $0x84] ss:$8 sm:$0xf] }
  0x63   : > { %v862_v55 = vld [vmem:[%s1297_s3 + $0x83] ss:$8 sm:$0xf0]  ;;  %v879_v62 = vld [vmem:[%s1297_s3 + $0x84] ss:$8 sm:$0xf0]  ;;  %v667_v12 = vmul.f32 %v1359_v0, %v640_v51 }
  0x64   : > { %v475_v56 = vadd.f32 %v467_v34, %v425_v45  ;;  %v268_v58 = vmul.f32 %v1315_v14, %v244_v47  ;;  %v344_v60 = vor.u32 %v862_v55, %v861_v54  ;;  %v318_v1 = vmul.f32 %v1321_v20, %v294_v53  ;;  %v895_v3 = vld [vmem:[%s1297_s3 + $0x85] ss:$8 sm:$0xf]  ;;  %v912_v9 = vld [vmem:[%s1297_s3 + $0x86] ss:$8 sm:$0xf] }
  0x65   : > { %v394_v2 = vor.u32 %v879_v62, %v878_v61  ;;  %v896_v4 = vld [vmem:[%s1297_s3 + $0x85] ss:$8 sm:$0xf0]  ;;  %v913_v11 = vld [vmem:[%s1297_s3 + $0x86] ss:$8 sm:$0xf0] }
  0x66   : > { %v525_v5 = vadd.f32 %v517_v46, %v475_v56  ;;  %v276_v6 = vadd.f32 %v268_v58, %v226_v52  ;;  %v368_v7 = vmul.f32 %v1326_v25, %v344_v60  ;;  %v444_v8 = vor.u32 %v896_v4, %v895_v3  ;;  %v929_v13 = vld [vmem:[%s1297_s3 + $0x87] ss:$8 sm:$0xf]  ;;  %v946_v21 = vld [vmem:[%s1297_s3 + $0x280] ss:$8 sm:$0xf] }
  0x67   : > { %v930_v15 = vld [vmem:[%s1297_s3 + $0x87] ss:$8 sm:$0xf0]  ;;  %v418_v18 = vmul.f32 %v1332_v32, %v394_v2  ;;  %v494_v19 = vor.u32 %v913_v11, %v912_v9  ;;  %v947_v22 = vld [vmem:[%s1297_s3 + $0x280] ss:$8 sm:$0xf0] }
  0x68   : > { %v575_v16 = vadd.f32 %v567_v57, %v525_v5  ;;  %v326_v17 = vadd.f32 %v318_v1, %v276_v6  ;;  %v963_v23 = vld [vmem:[%s1297_s3 + $0x281] ss:$8 sm:$0xf]  ;;  %v468_v28 = vmul.f32 %v1336_v36, %v444_v8  ;;  %v544_v29 = vor.u32 %v930_v15, %v929_v13  ;;  %v812_v30 = vld [vmem:[%s1297_s3 + $0xc0] ss:$8 sm:$0xf] }
  0x69   : > { %v964_v24 = vld [vmem:[%s1297_s3 + $0x281] ss:$8 sm:$0xf0]  ;;  %v813_v31 = vld [vmem:[%s1297_s3 + $0xc0] ss:$8 sm:$0xf0]  ;;  %v594_v33 = vor.u32 %v947_v22, %v946_v21  ;;  %v518_v40 = vmul.f32 %v1342_v43, %v494_v19 }
  0x6a   : > { %v625_v26 = vadd.f32 %v617_v63, %v575_v16  ;;  %v376_v27 = vadd.f32 %v368_v7, %v326_v17  ;;  %v206_v34 = vor.u32 %v813_v31, %v812_v30  ;;  %v829_v35 = vld [vmem:[%s1297_s3 + $0xc1] ss:$8 sm:$0xf]  ;;  %v846_v42 = vld [vmem:[%s1297_s3 + $0xc2] ss:$8 sm:$0xf]  ;;  %v644_v45 = vor.u32 %v964_v24, %v963_v23 }
  0x6b   : > { %v830_v37 = vld [vmem:[%s1297_s3 + $0xc1] ss:$8 sm:$0xf0]  ;;  %v847_v44 = vld [vmem:[%s1297_s3 + $0xc2] ss:$8 sm:$0xf0]  ;;  %v568_v52 = vmul.f32 %v1347_v49, %v544_v29  ;;  %v618_v57 = vmul.f32 %v1354_v59, %v594_v33 }
  0x6c   : > { %v675_v38 = vadd.f32 %v667_v12, %v625_v26  ;;  %v426_v39 = vadd.f32 %v418_v18, %v376_v27  ;;  %v248_v41 = vor.u32 %v830_v37, %v829_v35  ;;  %v227_v46 = vmul.f32 %v1311_v10, %v206_v34  ;;  %v863_v48 = vld [vmem:[%s1297_s3 + $0xc3] ss:$8 sm:$0xf]  ;;  %v880_v55 = vld [vmem:[%s1297_s3 + $0xc4] ss:$8 sm:$0xf] }
  0x6d   : > { %v298_v47 = vor.u32 %v847_v44, %v846_v42  ;;  %v864_v50 = vld [vmem:[%s1297_s3 + $0xc3] ss:$8 sm:$0xf0]  ;;  %v881_v56 = vld [vmem:[%s1297_s3 + $0xc4] ss:$8 sm:$0xf0]  ;;  %v668_v6 = vmul.f32 %v1359_v0, %v644_v45 }
  0x6e   : > { %683 = vst [vmem:[%s1389_s7 + $0x8] sm:$0xff] %v675_v38  ;;  %v476_v51 = vadd.f32 %v468_v28, %v426_v39  ;;  %v269_v53 = vmul.f32 %v1315_v14, %v248_v41  ;;  %v348_v54 = vor.u32 %v864_v50, %v863_v48  ;;  %v398_v60 = vor.u32 %v881_v56, %v880_v55  ;;  %v897_v61 = vld [vmem:[%s1297_s3 + $0xc5] ss:$8 sm:$0xf] }
  0x6f   : > { %v319_v58 = vmul.f32 %v1321_v20, %v298_v47  ;;  %v898_v62 = vld [vmem:[%s1297_s3 + $0xc5] ss:$8 sm:$0xf0]  ;;  %v914_v4 = vld [vmem:[%s1297_s3 + $0xc6] ss:$8 sm:$0xf] }
  0x70   : > { %v526_v63 = vadd.f32 %v518_v40, %v476_v51  ;;  %v277_v1 = vadd.f32 %v269_v53, %v227_v46  ;;  %v369_v2 = vmul.f32 %v1326_v25, %v348_v54  ;;  %v448_v3 = vor.u32 %v898_v62, %v897_v61  ;;  %v915_v5 = vld [vmem:[%s1297_s3 + $0xc6] ss:$8 sm:$0xf0]  ;;  %v931_v7 = vld [vmem:[%s1297_s3 + $0xc7] ss:$8 sm:$0xf] }
  0x71   : > { %v932_v8 = vld [vmem:[%s1297_s3 + $0xc7] ss:$8 sm:$0xf0]  ;;  %v419_v12 = vmul.f32 %v1332_v32, %v398_v60  ;;  %v498_v13 = vor.u32 %v915_v5, %v914_v4  ;;  %v948_v15 = vld [vmem:[%s1297_s3 + $0x2c0] ss:$8 sm:$0xf] }
  0x72   : > { %v576_v9 = vadd.f32 %v568_v52, %v526_v63  ;;  %v327_v11 = vadd.f32 %v319_v58, %v277_v1  ;;  %v949_v16 = vld [vmem:[%s1297_s3 + $0x2c0] ss:$8 sm:$0xf0]  ;;  %v965_v17 = vld [vmem:[%s1297_s3 + $0x2c1] ss:$8 sm:$0xf]  ;;  %v469_v22 = vmul.f32 %v1336_v36, %v448_v3  ;;  %v548_v23 = vor.u32 %v932_v8, %v931_v7 }
  0x73   : > { %v966_v18 = vld [vmem:[%s1297_s3 + $0x2c1] ss:$8 sm:$0xf0]  ;;  %v814_v24 = vld [vmem:[%s1297_s3 + $0x100] ss:$8 sm:$0xf]  ;;  %v598_v27 = vor.u32 %v949_v16, %v948_v15  ;;  %v519_v34 = vmul.f32 %v1342_v43, %v498_v13 }
  0x74   : > { %v626_v19 = vadd.f32 %v618_v57, %v576_v9  ;;  %v377_v21 = vadd.f32 %v369_v2, %v327_v11  ;;  %v815_v26 = vld [vmem:[%s1297_s3 + $0x100] ss:$8 sm:$0xf0]  ;;  %v831_v29 = vld [vmem:[%s1297_s3 + $0x101] ss:$8 sm:$0xf]  ;;  %v648_v39 = vor.u32 %v966_v18, %v965_v17  ;;  %v569_v46 = vmul.f32 %v1347_v49, %v548_v23 }
  0x75   : > { %v210_v28 = vor.u32 %v815_v26, %v814_v24  ;;  %v832_v30 = vld [vmem:[%s1297_s3 + $0x101] ss:$8 sm:$0xf0]  ;;  %v848_v37 = vld [vmem:[%s1297_s3 + $0x102] ss:$8 sm:$0xf]  ;;  %v619_v52 = vmul.f32 %v1354_v59, %v598_v27 }
  0x76   : > { %v676_v31 = vadd.f32 %v668_v6, %v626_v19  ;;  %v427_v33 = vadd.f32 %v419_v12, %v377_v21  ;;  %v252_v35 = vor.u32 %v832_v30, %v831_v29  ;;  %v849_v38 = vld [vmem:[%s1297_s3 + $0x102] ss:$8 sm:$0xf0]  ;;  %v865_v42 = vld [vmem:[%s1297_s3 + $0x103] ss:$8 sm:$0xf]  ;;  %v669_v1 = vmul.f32 %v1359_v0, %v648_v39 }
  0x77   : > { %v228_v40 = vmul.f32 %v1311_v10, %v210_v28  ;;  %v302_v41 = vor.u32 %v849_v38, %v848_v37  ;;  %v866_v44 = vld [vmem:[%s1297_s3 + $0x103] ss:$8 sm:$0xf0]  ;;  %v882_v50 = vld [vmem:[%s1297_s3 + $0x104] ss:$8 sm:$0xf] }
  0x78   : > { %684 = vst [vmem:[%s1389_s7 + $0x10] sm:$0xff] %v676_v31  ;;  %v477_v45 = vadd.f32 %v469_v22, %v427_v33  ;;  %v270_v47 = vmul.f32 %v1315_v14, %v252_v35  ;;  %v352_v48 = vor.u32 %v866_v44, %v865_v42  ;;  %v883_v51 = vld [vmem:[%s1297_s3 + $0x104] ss:$8 sm:$0xf0] }
  0x79   : > { %v320_v53 = vmul.f32 %v1321_v20, %v302_v41  ;;  %v402_v54 = vor.u32 %v883_v51, %v882_v50  ;;  %v899_v55 = vld [vmem:[%s1297_s3 + $0x105] ss:$8 sm:$0xf]  ;;  %v916_v62 = vld [vmem:[%s1297_s3 + $0x106] ss:$8 sm:$0xf] }
  0x7a   : > { %v900_v56 = vld [vmem:[%s1297_s3 + $0x105] ss:$8 sm:$0xf0]  ;;  %v527_v57 = vadd.f32 %v519_v34, %v477_v45  ;;  %v278_v58 = vadd.f32 %v270_v47, %v228_v40  ;;  %v370_v60 = vmul.f32 %v1326_v25, %v352_v48  ;;  %v917_v63 = vld [vmem:[%s1297_s3 + $0x106] ss:$8 sm:$0xf0] }
  0x7b   : > { %v452_v61 = vor.u32 %v900_v56, %v899_v55  ;;  %v933_v2 = vld [vmem:[%s1297_s3 + $0x107] ss:$8 sm:$0xf]  ;;  %v420_v6 = vmul.f32 %v1332_v32, %v402_v54  ;;  %v502_v7 = vor.u32 %v917_v63, %v916_v62  ;;  %v950_v8 = vld [vmem:[%s1297_s3 + $0x300] ss:$8 sm:$0xf] }
  0x7c   : > { %v934_v3 = vld [vmem:[%s1297_s3 + $0x107] ss:$8 sm:$0xf0]  ;;  %v577_v4 = vadd.f32 %v569_v46, %v527_v57  ;;  %v328_v5 = vadd.f32 %v320_v53, %v278_v58  ;;  %v951_v9 = vld [vmem:[%s1297_s3 + $0x300] ss:$8 sm:$0xf0] }
  0x7d   : > { %v967_v11 = vld [vmem:[%s1297_s3 + $0x301] ss:$8 sm:$0xf]  ;;  %v470_v16 = vmul.f32 %v1336_v36, %v452_v61  ;;  %v552_v17 = vor.u32 %v934_v3, %v933_v2  ;;  %v816_v18 = vld [vmem:[%s1297_s3 + $0x140] ss:$8 sm:$0xf]  ;;  %v602_v21 = vor.u32 %v951_v9, %v950_v8  ;;  %v520_v28 = vmul.f32 %v1342_v43, %v502_v7 }
  0x7e   : > { %v968_v12 = vld [vmem:[%s1297_s3 + $0x301] ss:$8 sm:$0xf0]  ;;  %v627_v13 = vadd.f32 %v619_v52, %v577_v4  ;;  %v378_v15 = vadd.f32 %v370_v60, %v328_v5  ;;  %v817_v19 = vld [vmem:[%s1297_s3 + $0x140] ss:$8 sm:$0xf0] }
  0x7f   : > { %v214_v22 = vor.u32 %v817_v19, %v816_v18  ;;  %v833_v23 = vld [vmem:[%s1297_s3 + $0x141] ss:$8 sm:$0xf]  ;;  %v850_v30 = vld [vmem:[%s1297_s3 + $0x142] ss:$8 sm:$0xf]  ;;  %v652_v33 = vor.u32 %v968_v12, %v967_v11  ;;  %v570_v40 = vmul.f32 %v1347_v49, %v552_v17  ;;  %v620_v46 = vmul.f32 %v1354_v59, %v602_v21 }
  0x80   : > { %v834_v24 = vld [vmem:[%s1297_s3 + $0x141] ss:$8 sm:$0xf0]  ;;  %v677_v26 = vadd.f32 %v669_v1, %v627_v13  ;;  %v428_v27 = vadd.f32 %v420_v6, %v378_v15  ;;  %v851_v31 = vld [vmem:[%s1297_s3 + $0x142] ss:$8 sm:$0xf0] }
  0x81   : > { %v256_v29 = vor.u32 %v834_v24, %v833_v23  ;;  %v229_v34 = vmul.f32 %v1311_v10, %v214_v22  ;;  %v306_v35 = vor.u32 %v851_v31, %v850_v30  ;;  %v867_v37 = vld [vmem:[%s1297_s3 + $0x143] ss:$8 sm:$0xf]  ;;  %v884_v44 = vld [vmem:[%s1297_s3 + $0x144] ss:$8 sm:$0xf]  ;;  %v670_v58 = vmul.f32 %v1359_v0, %v652_v33 }
  0x82   : > { %v868_v38 = vld [vmem:[%s1297_s3 + $0x143] ss:$8 sm:$0xf0]  ;;  %685 = vst [vmem:[%s1389_s7 + $0x18] sm:$0xff] %v677_v26  ;;  %v478_v39 = vadd.f32 %v470_v16, %v428_v27 }
  0x83   : > { %v271_v41 = vmul.f32 %v1315_v14, %v256_v29  ;;  %v356_v42 = vor.u32 %v868_v38, %v867_v37  ;;  %v885_v45 = vld [vmem:[%s1297_s3 + $0x144] ss:$8 sm:$0xf0]  ;;  %v321_v47 = vmul.f32 %v1321_v20, %v306_v35  ;;  %v901_v50 = vld [vmem:[%s1297_s3 + $0x145] ss:$8 sm:$0xf] }
  0x84   : > { %v406_v48 = vor.u32 %v885_v45, %v884_v44  ;;  %v902_v51 = vld [vmem:[%s1297_s3 + $0x145] ss:$8 sm:$0xf0]  ;;  %v528_v52 = vadd.f32 %v520_v28, %v478_v39  ;;  %v918_v56 = vld [vmem:[%s1297_s3 + $0x146] ss:$8 sm:$0xf] }
  0x85   : > { %v279_v53 = vadd.f32 %v271_v41, %v229_v34  ;;  %v371_v54 = vmul.f32 %v1326_v25, %v356_v42  ;;  %v456_v55 = vor.u32 %v902_v51, %v901_v50  ;;  %v919_v57 = vld [vmem:[%s1297_s3 + $0x146] ss:$8 sm:$0xf0]  ;;  %v935_v60 = vld [vmem:[%s1297_s3 + $0x147] ss:$8 sm:$0xf] }
  0x86   : > { %v936_v61 = vld [vmem:[%s1297_s3 + $0x147] ss:$8 sm:$0xf0]  ;;  %v578_v62 = vadd.f32 %v570_v40, %v528_v52  ;;  %v421_v1 = vmul.f32 %v1332_v32, %v406_v48  ;;  %v506_v2 = vor.u32 %v919_v57, %v918_v56  ;;  %v952_v3 = vld [vmem:[%s1297_s3 + $0x340] ss:$8 sm:$0xf] }
  0x87   : > { %v329_v63 = vadd.f32 %v321_v47, %v279_v53  ;;  %v953_v4 = vld [vmem:[%s1297_s3 + $0x340] ss:$8 sm:$0xf0]  ;;  %v969_v5 = vld [vmem:[%s1297_s3 + $0x341] ss:$8 sm:$0xf]  ;;  %v471_v9 = vmul.f32 %v1336_v36, %v456_v55  ;;  %v556_v11 = vor.u32 %v936_v61, %v935_v60 }
  0x88   : > { %v970_v6 = vld [vmem:[%s1297_s3 + $0x341] ss:$8 sm:$0xf0]  ;;  %v628_v7 = vadd.f32 %v620_v46, %v578_v62  ;;  %v818_v12 = vld [vmem:[%s1297_s3 + $0x180] ss:$8 sm:$0xf]  ;;  %v606_v15 = vor.u32 %v953_v4, %v952_v3  ;;  %v521_v22 = vmul.f32 %v1342_v43, %v506_v2 }
  0x89   : > { %v379_v8 = vadd.f32 %v371_v54, %v329_v63  ;;  %v819_v13 = vld [vmem:[%s1297_s3 + $0x180] ss:$8 sm:$0xf0]  ;;  %v835_v17 = vld [vmem:[%s1297_s3 + $0x181] ss:$8 sm:$0xf]  ;;  %v656_v27 = vor.u32 %v970_v6, %v969_v5  ;;  %v571_v34 = vmul.f32 %v1347_v49, %v556_v11 }
  0x8a   : > { %v218_v16 = vor.u32 %v819_v13, %v818_v12  ;;  %v836_v18 = vld [vmem:[%s1297_s3 + $0x181] ss:$8 sm:$0xf0]  ;;  %v678_v19 = vadd.f32 %v670_v58, %v628_v7  ;;  %v852_v24 = vld [vmem:[%s1297_s3 + $0x182] ss:$8 sm:$0xf]  ;;  %v621_v40 = vmul.f32 %v1354_v59, %v606_v15 }
  0x8b   : > { %v429_v21 = vadd.f32 %v421_v1, %v379_v8  ;;  %v260_v23 = vor.u32 %v836_v18, %v835_v17  ;;  %v853_v26 = vld [vmem:[%s1297_s3 + $0x182] ss:$8 sm:$0xf0]  ;;  %v869_v30 = vld [vmem:[%s1297_s3 + $0x183] ss:$8 sm:$0xf]  ;;  %v671_v53 = vmul.f32 %v1359_v0, %v656_v27 }
  0x8c   : > { %v230_v28 = vmul.f32 %v1311_v10, %v218_v16  ;;  %v310_v29 = vor.u32 %v853_v26, %v852_v24  ;;  %v870_v31 = vld [vmem:[%s1297_s3 + $0x183] ss:$8 sm:$0xf0]  ;;  %686 = vst [vmem:[%s1389_s7 + $0x20] sm:$0xff] %v678_v19 }
  0x8d   : > { %v479_v33 = vadd.f32 %v471_v9, %v429_v21  ;;  %v272_v35 = vmul.f32 %v1315_v14, %v260_v23  ;;  %v360_v37 = vor.u32 %v870_v31, %v869_v30  ;;  %v886_v38 = vld [vmem:[%s1297_s3 + $0x184] ss:$8 sm:$0xf]  ;;  %v903_v44 = vld [vmem:[%s1297_s3 + $0x185] ss:$8 sm:$0xf] }
  0x8e   : > { %v887_v39 = vld [vmem:[%s1297_s3 + $0x184] ss:$8 sm:$0xf0]  ;;  %v322_v41 = vmul.f32 %v1321_v20, %v310_v29  ;;  %v904_v45 = vld [vmem:[%s1297_s3 + $0x185] ss:$8 sm:$0xf0] }
  0x8f   : > { %v410_v42 = vor.u32 %v887_v39, %v886_v38  ;;  %v529_v46 = vadd.f32 %v521_v22, %v479_v33  ;;  %v280_v47 = vadd.f32 %v272_v35, %v230_v28  ;;  %v372_v48 = vmul.f32 %v1326_v25, %v360_v37  ;;  %v920_v51 = vld [vmem:[%s1297_s3 + $0x186] ss:$8 sm:$0xf]  ;;  %v937_v54 = vld [vmem:[%s1297_s3 + $0x187] ss:$8 sm:$0xf] }
  0x90   : > { %v460_v50 = vor.u32 %v904_v45, %v903_v44  ;;  %v921_v52 = vld [vmem:[%s1297_s3 + $0x186] ss:$8 sm:$0xf0]  ;;  %v938_v55 = vld [vmem:[%s1297_s3 + $0x187] ss:$8 sm:$0xf0] }
  0x91   : > { %v579_v56 = vadd.f32 %v571_v34, %v529_v46  ;;  %v330_v57 = vadd.f32 %v322_v41, %v280_v47  ;;  %v422_v58 = vmul.f32 %v1332_v32, %v410_v42  ;;  %v510_v60 = vor.u32 %v921_v52, %v920_v51  ;;  %v954_v61 = vld [vmem:[%s1297_s3 + $0x380] ss:$8 sm:$0xf]  ;;  %v971_v63 = vld [vmem:[%s1297_s3 + $0x381] ss:$8 sm:$0xf] }
  0x92   : > { %v955_v62 = vld [vmem:[%s1297_s3 + $0x380] ss:$8 sm:$0xf0]  ;;  %v972_v1 = vld [vmem:[%s1297_s3 + $0x381] ss:$8 sm:$0xf0]  ;;  %v472_v4 = vmul.f32 %v1336_v36, %v460_v50  ;;  %v560_v5 = vor.u32 %v938_v55, %v937_v54 }
  0x93   : > { %v629_v2 = vadd.f32 %v621_v40, %v579_v56  ;;  %v380_v3 = vadd.f32 %v372_v48, %v330_v57  ;;  %v820_v6 = vld [vmem:[%s1297_s3 + $0x1c0] ss:$8 sm:$0xf]  ;;  %v610_v8 = vor.u32 %v955_v62, %v954_v61  ;;  %v837_v11 = vld [vmem:[%s1297_s3 + $0x1c1] ss:$8 sm:$0xf]  ;;  %v522_v16 = vmul.f32 %v1342_v43, %v510_v60 }
  0x94   : > { %v821_v7 = vld [vmem:[%s1297_s3 + $0x1c0] ss:$8 sm:$0xf0]  ;;  %v838_v12 = vld [vmem:[%s1297_s3 + $0x1c1] ss:$8 sm:$0xf0]  ;;  %v660_v21 = vor.u32 %v972_v1, %v971_v63  ;;  %v572_v28 = vmul.f32 %v1347_v49, %v560_v5 }
  0x95   : > { %v222_v9 = vor.u32 %v821_v7, %v820_v6  ;;  %v679_v13 = vadd.f32 %v671_v53, %v629_v2  ;;  %v430_v15 = vadd.f32 %v422_v58, %v380_v3  ;;  %v264_v17 = vor.u32 %v838_v12, %v837_v11  ;;  %v854_v18 = vld [vmem:[%s1297_s3 + $0x1c2] ss:$8 sm:$0xf]  ;;  %v871_v24 = vld [vmem:[%s1297_s3 + $0x1c3] ss:$8 sm:$0xf] }
  0x96   : > { %v855_v19 = vld [vmem:[%s1297_s3 + $0x1c2] ss:$8 sm:$0xf0]  ;;  %v872_v26 = vld [vmem:[%s1297_s3 + $0x1c3] ss:$8 sm:$0xf0]  ;;  %v622_v34 = vmul.f32 %v1354_v59, %v610_v8  ;;  %v672_v45 = vmul.f32 %v1359_v0, %v660_v21 }
  0x97   : > { %v231_v22 = vmul.f32 %v1311_v10, %v222_v9  ;;  %v314_v23 = vor.u32 %v855_v19, %v854_v18  ;;  %687 = vst [vmem:[%s1389_s7 + $0x28] sm:$0xff] %v679_v13  ;;  %v480_v27 = vadd.f32 %v472_v4, %v430_v15  ;;  %v273_v29 = vmul.f32 %v1315_v14, %v264_v17  ;;  %v888_v31 = vld [vmem:[%s1297_s3 + $0x1c4] ss:$8 sm:$0xf] }
  0x98   : > { %v364_v30 = vor.u32 %v872_v26, %v871_v24  ;;  %v889_v33 = vld [vmem:[%s1297_s3 + $0x1c4] ss:$8 sm:$0xf0]  ;;  %v905_v37 = vld [vmem:[%s1297_s3 + $0x1c5] ss:$8 sm:$0xf] }
  0x99   : > { %v323_v10 = vmul.f32 %v1321_v20, %v314_v23  ;;  %v414_v35 = vor.u32 %v889_v33, %v888_v31  ;;  %v906_v38 = vld [vmem:[%s1297_s3 + $0x1c5] ss:$8 sm:$0xf0]  ;;  %v530_v39 = vadd.f32 %v522_v16, %v480_v27  ;;  %v281_v40 = vadd.f32 %v273_v29, %v231_v22  ;;  %v922_v14 = vld [vmem:[%s1297_s3 + $0x1c6] ss:$8 sm:$0xf] }
  0x9a   : > { %v373_v41 = vmul.f32 %v1326_v25, %v364_v30  ;;  %v464_v42 = vor.u32 %v906_v38, %v905_v37  ;;  %v923_v44 = vld [vmem:[%s1297_s3 + $0x1c6] ss:$8 sm:$0xf0]  ;;  %v939_v46 = vld [vmem:[%s1297_s3 + $0x1c7] ss:$8 sm:$0xf] }
  0x9b   : > { %v940_v47 = vld [vmem:[%s1297_s3 + $0x1c7] ss:$8 sm:$0xf0]  ;;  %v580_v48 = vadd.f32 %v572_v28, %v530_v39  ;;  %v331_v20 = vadd.f32 %v323_v10, %v281_v40  ;;  %v423_v50 = vmul.f32 %v1332_v32, %v414_v35  ;;  %v514_v51 = vor.u32 %v923_v44, %v922_v14  ;;  %v956_v52 = vld [vmem:[%s1297_s3 + $0x3c0] ss:$8 sm:$0xf] }
  0x9c   : > { %v957_v53 = vld [vmem:[%s1297_s3 + $0x3c0] ss:$8 sm:$0xf0]  ;;  %v473_v25 = vmul.f32 %v1336_v36, %v464_v42  ;;  %v564_v56 = vor.u32 %v940_v47, %v939_v46  ;;  %v973_v57 = vld [vmem:[%s1297_s3 + $0x3c1] ss:$8 sm:$0xf] }
  0x9d   : > { %v630_v54 = vadd.f32 %v622_v34, %v580_v48  ;;  %v381_v55 = vadd.f32 %v373_v41, %v331_v20  ;;  %v974_v58 = vld [vmem:[%s1297_s3 + $0x3c1] ss:$8 sm:$0xf0]  ;;  %v523_v62 = vmul.f32 %v1342_v43, %v514_v51  ;;  %v614_v63 = vor.u32 %v957_v53, %v956_v52 }
  0x9e   : > { %v573_v32 = vmul.f32 %v1347_v49, %v564_v56  ;;  %v664_v2 = vor.u32 %v974_v58, %v973_v57 }
  0x9f   : > { %v680_v60 = vadd.f32 %v672_v45, %v630_v54  ;;  %v431_v61 = vadd.f32 %v423_v50, %v381_v55  ;;  %v623_v4 = vmul.f32 %v1354_v59, %v614_v63 }
  0xa0   : > { %v673_v36 = vmul.f32 %v1359_v0, %v664_v2 }
  0xa1   : > { %688 = vst [vmem:[%s1389_s7 + $0x30] sm:$0xff] %v680_v60  ;;  %v481_v1 = vadd.f32 %v473_v25, %v431_v61 }
  0xa3   : > { %v531_v3 = vadd.f32 %v523_v62, %v481_v1 }
  0xa5   : > { %v581_v5 = vadd.f32 %v573_v32, %v531_v3 }
  0xa7   : > { %v631_v6 = vadd.f32 %v623_v4, %v581_v5  ;;  %697 = sbr.rel (!%p1636_p6) target bundleno = 198 (0xc6), region = 40 }
  0xa9   : > { %v681_v7 = vadd.f32 %v673_v36, %v631_v6 }
  0xab   : > { %689 = vst [vmem:[%s1389_s7 + $0x38] sm:$0xff] %v681_v7 }
  0xac   : > { %s1645_s24 = smov (!%p700_p12, %s699_s24), 64 }
  0xad   : > { %s1580_s26 = sshll.u32 %s1645_s24, 4 }
  0xae   : > { %s704_s30 = ssub.s32 1024, %s1580_s26 }
  0xaf   : > { %705 = vsyncadd %s691_s8, %s704_s30  ;;  %p978_p13 = scmp.ne.s32.totalorder %s1580_s26, 0  ;;  %s985_s21 = sshll.u32 %s1186_s13, 10 }
  0xb0   : > { %s708_s5 = scalar_lea.hbm %s1627_s2, %s985_s21  ;;  %s710_s20 = sshll.u32 %s1389_s7, 4  ;;  %s711_s20 = int_to_ptr.vmem [resolvable:$true] %s710_s20 }
  0xb1   : > { %s1075_s16 = scalar_lea.vmem %s711_s20, %s1580_s26  ;;  %s1149_s17 = smov [#allocation7]  }
  0xb2   : > { %p1076_p5 = scmp.ne.s32.totalorder %s711_s20, %s1075_s16  ;;  %s1079_s19 = sshll.u32 %s1149_s17, 4  ;;  %s1080_s19 = int_to_ptr.vmem [resolvable:$false] %s1079_s19 }
  0xb3   : > { %s1081_s27 = scalar_lea.vmem %s1080_s19, 2048  ;;  %p1082_p2 = scmp.lt.s32.totalorder %s711_s20, %s1080_s19 }
  0xb4   : > { %p1077_p9 = pnand %p1076_p5, %p978_p13  ;;  %p1083_p0 = scmp.lt.s32.totalorder %s1081_s27, %s1075_s16 }
  0xb6   : > { %p1078_p1 = pneg %p1077_p9  ;;  %p1084_p3 = por %p1083_p0, %p1082_p2 }
  0xb8   : > { %p1085_p7 = pnand %p1084_p3, %p1078_p1 }
  0xba   : > { %1088 = shalt.err (!%p1085_p7)
}
  0xbb   : > { %s1089_s13 = scalar_lea.hbm %s708_s5, %s1580_s26  ;;  %s1093_s4 = scalar_lea.hbm %s1627_s2, 3120 }
  0xbc   : > { %p1090_p8 = scmp.ne.s32.totalorder %s708_s5, %s1089_s13  ;;  %p1094_p11 = scmp.lt.s32.totalorder %s708_s5, %s1627_s2 }
  0xbd   : > { %p1095_p6 = scmp.lt.s32.totalorder %s1093_s4, %s1089_s13 }
  0xbe   : > { %p1091_p10 = pnand %p1090_p8, %p978_p13 }
  0xbf   : > { %p1096_p12 = por %p1095_p6, %p1094_p11 }
  0xc0   : > { %p1092_p4 = pneg %p1091_p10 }
  0xc2   : > { %p1097_p5 = pnand %p1096_p12, %p1092_p4 }
  0xc4   : > { %1100 = shalt.err (!%p1097_p5)
}
  0xc5   : > { %713 = dma.vmem_to_hbm [thread:$0]  (%p978_p13), %s711_s20, %s1580_s26, %s708_s5, %s691_s8  }
  0xc6 PF: > { %p1002_p9 = scmp.ge.s32.totalorder %s1143_s12, 2  ;;  %s722_s14 = sand.u32 1, %s1131_s9  }
  0xc7   : > { %p1637_p1 = scmp.ne.s32.totalorder %s1632_s22, 0  ;;  %s723_s24 = scalar_lea.sflag [#allocation4], %s722_s14 }
  0xc9   : > { %p997_p2 = pnand %p1002_p9, %p1637_p1 }
  0xcb   : > { %p998_p0 = pneg %p997_p2 }
  0xcd   : > { %1126 = dma.done.wait (%p998_p0), %s723_s24, 1024  }
  0xce   : > { %1128 = vsyncadd (%p998_p0), %s723_s24, 4294966272  ;;  %p16_p3 = scmp.ge.s32.totalorder %s1190_s15, 6   ;;  %s1638_s9 = smov %s1135_s10 }
  0xcf   : > { %s1639_s10 = smov %s1139_s11  ;;  %s1640_s11 = smov %s1202_s18 }
  0xd0   : > { %s1641_s12 = smov %s1190_s15  ;;  %18 = sbr.rel (!%p16_p3) target bundleno = 6 (0x6), region = 157 }
  0xd5   :  { %728 = vsyncpa [#allocation3], 1 }
  0xd6   :  { %730 = vsyncpa [#allocation3 + $0x1], 1 }
  0xd7   :  { %731 = vsyncpa [#allocation4], 1 }
  0xd8   :  { %733 = vsyncpa [#allocation4 + $0x1], 1 }
  0xd9   :  { %734 = vsyncpa [#allocation5], 1 }
  0xda   :  { %736 = vsyncpa [#allocation5 + $0x1], 1 }

</bundles_post_ra>
